<compile_context>
chip_gen: v7x
topology: tpu7x:2x2x1
jax: 0.10.0
libtpu: 0.0.40
codegen_flags: <defaults>
</compile_context>

<pallas_src>
import jax
import jax.numpy as jnp
from jax.experimental import pallas as pl
from jax.experimental.pallas import tpu as pltpu


def _spec(block_shape, index_map, buffers=None):
    """BlockSpec with an optional explicit buffer count.

    buffers=1 single-buffers blocks whose index never changes (halves their
    VMEM footprint, per perf review); buffers=3 deepens pipelining of streamed
    tiles (useful on v5e).  Falls back to a plain BlockSpec if this jax build
    does not expose pipeline_mode / Buffered.
    """
    if buffers is not None and hasattr(pl, "Buffered"):
        try:
            return pl.BlockSpec(block_shape, index_map,
                                pipeline_mode=pl.Buffered(buffers))
        except TypeError:
            pass
    return pl.BlockSpec(block_shape, index_map)


# ---------------------------------------------------------------------------
# Pass 1: per-core partial of
#   node_comb[v] = node_feats[v]@Wx + segment_sum(msg, dst)[v]@Whid + bias
# Grid = (core_splits ["parallel"], edge_tiles ["arbitrary"]).
# The output block (one [Np, H] slab per core) is resident across the
# reduction axis and is used directly as the accumulator (no scratch).
# ---------------------------------------------------------------------------
def _node_comb_kernel(dst_ref, msg_ref, node_ref, w_in_x_ref, w_hid_ref,
                      bias_ref, partial_ref):
    c = pl.program_id(0)
    i = pl.program_id(1)

    @pl.when(i == 0)
    def _init():
        partial_ref[...] = jnp.zeros_like(partial_ref)

    n_pad = partial_ref.shape[0]
    tile_e = dst_ref.shape[1]
    # dst one-hot, transposed layout [Np, TE], built on the VPU (never in HBM).
    row_ids = jax.lax.broadcasted_iota(jnp.int32, (n_pad, tile_e), 0)
    dst_oh_t = (row_ids == dst_ref[...]).astype(msg_ref.dtype)
    # scatter-add this edge tile's messages onto nodes (MXU, f32 accumulate).
    partial_ref[...] += jnp.dot(dst_oh_t, msg_ref[...],
                                preferred_element_type=jnp.float32)

    @pl.when(i == pl.num_programs(1) - 1)
    def _finalize():
        node_sum = partial_ref[...]
        comb = jnp.dot(node_sum.astype(w_hid_ref.dtype), w_hid_ref[...],
                       preferred_element_type=jnp.float32)
        # node-feature linear term + fused bias are added exactly once
        # (core 0); other cores only contribute their scatter partial.
        node_term = (jnp.dot(node_ref[...], w_in_x_ref[...],
                             preferred_element_type=jnp.float32)
                     + bias_ref[...])
        gate = (c == 0).astype(jnp.float32)
        partial_ref[...] = comb + gate * node_term


# ---------------------------------------------------------------------------
# Pass 2 (parallel over edge tiles):
#   out[e] = node_comb[src(e)] + edge_feats[e]@We - msg[e]@Whid
# (bias is already folded into node_comb).
# ---------------------------------------------------------------------------
def _edge_out_kernel(src_ref, edge_ref, msg_ref, node_comb_ref,
                     w_in_e_ref, w_hid_ref, out_ref):
    tile_e = out_ref.shape[0]
    n_pad = node_comb_ref.shape[0]
    # src one-hot [TE, Np] built in-kernel.
    col_ids = jax.lax.broadcasted_iota(jnp.int32, (tile_e, n_pad), 1)
    src_oh = (col_ids == src_ref[...]).astype(node_comb_ref.dtype)
    gathered = jnp.dot(src_oh, node_comb_ref[...],
                       preferred_element_type=jnp.float32)
    out = (gathered
           + jnp.dot(edge_ref[...], w_in_e_ref[...],
                     preferred_element_type=jnp.float32)
           - jnp.dot(msg_ref[...], w_hid_ref[...],
                     preferred_element_type=jnp.float32))
    out_ref[...] = out.astype(out_ref.dtype)


def sampn_conv(node_feats, edge_feats, messages, src_idx, dst_idx,
               w_in, b_in, w_hid, b_hid, *,
               tile_e=512,                 # sweep 256..1024; big tiles amortize
               core_splits=2,              # v7x megacore split for pass 1
               use_bf16=False,             # opt-in bf16 MXU path (v6e/v7x)
               stream_buffers=None,        # e.g. 3 on v5e (HBM-latency bound)
               vmem_limit_bytes=64 * 1024 * 1024):
    """SAMPNConv forward. All matmuls / scatter / gather run inside Pallas."""
    N, Fn = node_feats.shape
    E, Fe = edge_feats.shape
    H = messages.shape[1]

    compute_dtype = jnp.bfloat16 if use_bf16 else jnp.float32
    dsize = jnp.dtype(compute_dtype).itemsize

    # --- parameter prep (PyTorch nn.Linear stores W as [out, in]) ---
    w_in_t = w_in.T.astype(jnp.float32)                        # [Fn+Fe, H]
    w_in_x = w_in_t[:Fn, :].astype(compute_dtype)              # [Fn, H]
    w_in_e = w_in_t[Fn:, :].astype(compute_dtype)              # [Fe, H]
    w_hid_t = w_hid.T.astype(compute_dtype)                    # [H, H]
    bias = (b_in + b_hid).reshape(1, H).astype(jnp.float32)    # fused bias

    # --- pad edges to core_splits * tiles_per_core * tile_e, nodes to x8 ---
    tiles_per_core = pl.cdiv(E, core_splits * tile_e)
    n_tiles = core_splits * tiles_per_core
    Ep = n_tiles * tile_e
    Np = ((N + 7) // 8) * 8
    pad_e, pad_n = Ep - E, Np - N

    nf = jnp.pad(node_feats.astype(compute_dtype), ((0, pad_n), (0, 0)))
    ef = jnp.pad(edge_feats.astype(compute_dtype), ((0, pad_e), (0, 0)))
    msg = jnp.pad(messages.astype(compute_dtype), ((0, pad_e), (0, 0)))
    # padded edges: dst=0 but msg=0 -> contribute nothing to node_sum;
    # their output rows are sliced off at the end.
    src = jnp.pad(src_idx.astype(jnp.int32), (0, pad_e)).reshape(Ep, 1)
    dst = jnp.pad(dst_idx.astype(jnp.int32), (0, pad_e)).reshape(1, Ep)

    # ---- pass 1: per-core node_comb partials [core_splits, Np, H] ----
    cost1 = pl.CostEstimate(
        flops=2 * Ep * Np * H + 2 * core_splits * Np * H * (H + Fn),
        transcendentals=0,
        bytes_accessed=(dsize * (Ep * H + Np * Fn + (Fn + H) * H)
                        + 4 * (Ep + H + core_splits * Np * H)),
    )
    partials = pl.pallas_call(
        _node_comb_kernel,
        out_shape=jax.ShapeDtypeStruct((core_splits, Np, H), jnp.float32),
        grid_spec=pltpu.PrefetchScalarGridSpec(
            num_scalar_prefetch=0,
            grid=(core_splits, tiles_per_core),
            in_specs=[
                # streamed per-edge-tile inputs
                _spec((1, tile_e), lambda c, i: (0, c * tiles_per_core + i),
                      stream_buffers),                                # dst idx
                _spec((tile_e, H), lambda c, i: (c * tiles_per_core + i, 0),
                      stream_buffers),                                # messages
                # resident (constant-index) inputs -> single-buffered
                _spec((Np, Fn), lambda c, i: (0, 0), 1),              # node feats
                _spec((Fn, H), lambda c, i: (0, 0), 1),               # Wx
                _spec((H, H), lambda c, i: (0, 0), 1),                # Whid
                _spec((1, H), lambda c, i: (0, 0), 1),                # fused bias
            ],
            out_specs=pl.BlockSpec((None, Np, H), lambda c, i: (c, 0, 0)),
        ),
        compiler_params=pltpu.CompilerParams(
            dimension_semantics=("parallel", "arbitrary"),
            vmem_limit_bytes=vmem_limit_bytes),
        cost_estimate=cost1,
    )(dst, msg, nf, w_in_x, w_hid_t, bias)

    # combine per-core partials (tiny [Np, H] add; exact for core_splits=1).
    node_comb = partials.sum(axis=0).astype(compute_dtype)

    # ---- pass 2: per-edge output [Ep, H], parallel over edge tiles ----
    cost2 = pl.CostEstimate(
        flops=2 * Ep * H * (Np + Fe + H),
        transcendentals=0,
        bytes_accessed=(dsize * (Ep * (Fe + H) + Np * H + (Fe + H) * H)
                        + 4 * (Ep + Ep * H)),
    )
    out = pl.pallas_call(
        _edge_out_kernel,
        out_shape=jax.ShapeDtypeStruct((Ep, H), jnp.float32),
        grid_spec=pltpu.PrefetchScalarGridSpec(
            num_scalar_prefetch=0,
            grid=(n_tiles,),
            in_specs=[
                _spec((tile_e, 1), lambda i: (i, 0), stream_buffers),   # src idx
                _spec((tile_e, Fe), lambda i: (i, 0), stream_buffers),  # edge feats
                _spec((tile_e, H), lambda i: (i, 0), stream_buffers),   # messages
                _spec((Np, H), lambda i: (0, 0), 1),                    # node_comb
                _spec((Fe, H), lambda i: (0, 0), 1),                    # We
                _spec((H, H), lambda i: (0, 0), 1),                     # Whid
            ],
            out_specs=pl.BlockSpec((tile_e, H), lambda i: (i, 0)),
        ),
        compiler_params=pltpu.CompilerParams(
            dimension_semantics=("parallel",),
            vmem_limit_bytes=vmem_limit_bytes),
        cost_estimate=cost2,
    )(src, ef, msg, node_comb, w_in_e, w_hid_t)

    return out[:E]


def sampn_conv_reference(node_feats, edge_feats, messages, src_idx, dst_idx,
                         w_in, b_in, w_hid, b_hid):
    N = node_feats.shape[0]
    node_sum = jax.ops.segment_sum(messages, dst_idx, num_segments=N)
    nb_sum = node_sum[src_idx] - messages
    cat = jnp.concatenate([node_feats[src_idx], edge_feats], axis=1)
    return cat @ w_in.T + b_in + nb_sum @ w_hid.T + b_hid


if __name__ == "__main__":
    # Small deterministic problem (E not a tile multiple, N not a multiple of 8,
    # to exercise the padding paths). H=128 keeps the output lane-dense.
    N, E = 12, 300
    Fn, Fe, H = 16, 16, 128

    key = jax.random.PRNGKey(0)
    ks = jax.random.split(key, 9)

    node_feats = jax.random.normal(ks[0], (N, Fn), dtype=jnp.float32)
    edge_feats = jax.random.normal(ks[1], (E, Fe), dtype=jnp.float32)
    messages = jax.random.normal(ks[2], (E, H), dtype=jnp.float32)
    src_idx = jax.random.randint(ks[3], (E,), 0, N)
    dst_idx = jax.random.randint(ks[4], (E,), 0, N)

    # PyTorch nn.Linear convention: W [out, in].
    w_in = 0.1 * jax.random.normal(ks[5], (H, Fn + Fe), dtype=jnp.float32)
    b_in = 0.1 * jax.random.normal(ks[6], (H,), dtype=jnp.float32)
    w_hid = 0.1 * jax.random.normal(ks[7], (H, H), dtype=jnp.float32)
    b_hid = 0.1 * jax.random.normal(ks[8], (H,), dtype=jnp.float32)

    ref = sampn_conv_reference(node_feats, edge_feats, messages, src_idx,
                               dst_idx, w_in, b_in, w_hid, b_hid)

    # f32 path (default): bit-for-math identical up to fp associativity.
    out = sampn_conv(node_feats, edge_feats, messages, src_idx, dst_idx,
                     w_in, b_in, w_hid, b_hid,
                     tile_e=512, core_splits=2)
    out = jax.block_until_ready(out)
    assert out.shape == (E, H)
    assert jnp.allclose(out, ref, atol=2e-3, rtol=2e-3), "f32 mismatch vs reference"

    # opt-in bf16 MXU path (v6e/v7x): one-hots stay exact, operands are bf16,
    # accumulation in f32 -> looser tolerance.
    out_bf16 = jax.block_until_ready(
        sampn_conv(node_feats, edge_feats, messages, src_idx, dst_idx,
                   w_in, b_in, w_hid, b_hid,
                   tile_e=512, core_splits=2, use_bf16=True))
    assert out_bf16.shape == (E, H)
    assert jnp.allclose(out_bf16, ref, atol=5e-1, rtol=5e-2), "bf16 mismatch vs reference"

    print("KERNEL_OK")
</pallas_src>

<mosaic_0001>
module attributes {stable_mosaic.version = 11 : i64} {
  func.func @_node_comb_kernel(%arg0: i32, %arg1: i32, %arg2: memref<1x512xi32, #tpu.memory_space<vmem>>, %arg3: memref<512x128xf32, #tpu.memory_space<vmem>>, %arg4: memref<16x16xf32, #tpu.memory_space<vmem>>, %arg5: memref<16x128xf32, #tpu.memory_space<vmem>>, %arg6: memref<128x128xf32, #tpu.memory_space<vmem>>, %arg7: memref<1x128xf32, #tpu.memory_space<vmem>>, %arg8: memref<1x16x128xf32, #tpu.memory_space<vmem>>) attributes {dimension_semantics = [#tpu.dimension_semantics<parallel>, #tpu.dimension_semantics<arbitrary>], iteration_bounds = array<i64: 2, 1>, scalar_prefetch = 0 : i64, scratch_operands = 0 : i64, tpu.core_type = #tpu.core_type<tc>, window_params = [{transform_indices = @transform_0, window_bounds = array<i64: 1, 512>}, {transform_indices = @transform_1, window_bounds = array<i64: 512, 128>}, {pipeline_mode = #tpu.pipeline_mode<synchronous>, transform_indices = @transform_2, window_bounds = array<i64: 16, 16>}, {pipeline_mode = #tpu.pipeline_mode<synchronous>, transform_indices = @transform_3, window_bounds = array<i64: 16, 128>}, {pipeline_mode = #tpu.pipeline_mode<synchronous>, transform_indices = @transform_4, window_bounds = array<i64: 128, 128>}, {pipeline_mode = #tpu.pipeline_mode<synchronous>, transform_indices = @transform_5, window_bounds = array<i64: 1, 128>}, {transform_indices = @transform_6, window_bounds = array<i64: 1, 16, 128>}]} {
    %c0_i32 = arith.constant 0 : i32
    %0 = arith.cmpi eq, %arg1, %c0_i32 : i32
    %1 = arith.extui %0 : i1 to i32
    %c0_i32_0 = arith.constant 0 : i32
    %2 = arith.cmpi ne, %1, %c0_i32_0 : i32
    scf.if %2 {
      %cst_12 = arith.constant 0.000000e+00 : f32
      %20 = vector.broadcast %cst_12 : f32 to vector<16x128xf32>
      %c0_13 = arith.constant 0 : index
      %c0_14 = arith.constant 0 : index
      %c0_15 = arith.constant 0 : index
      %21 = vector.load %arg8[%c0_13, %c0_14, %c0_15] : memref<1x16x128xf32, #tpu.memory_space<vmem>>, vector<1x16x128xf32>
      %22 = vector.shape_cast %21 : vector<1x16x128xf32> to vector<16x128xf32>
      %23 = vector.shape_cast %20 : vector<16x128xf32> to vector<1x16x128xf32>
      tpu.vector_store %arg8[%c0_13, %c0_14, %c0_15], %23 {strides = array<i32>} : memref<1x16x128xf32, #tpu.memory_space<vmem>>, vector<1x16x128xf32>,
    } else {
    }
    %3 = tpu.iota {dimensions = array<i32: 0>} : vector<16x512xi32>
    %c0 = arith.constant 0 : index
    %c0_1 = arith.constant 0 : index
    %4 = vector.load %arg2[%c0, %c0_1] : memref<1x512xi32, #tpu.memory_space<vmem>>, vector<1x512xi32>
    %5 = vector.broadcast %4 : vector<1x512xi32> to vector<16x512xi32>
    %6 = arith.cmpi eq, %3, %5 : vector<16x512xi32>
    %7 = arith.extui %6 : vector<16x512xi1> to vector<16x512xi32>
    %8 = arith.sitofp %7 : vector<16x512xi32> to vector<16x512xf32>
    %c0_2 = arith.constant 0 : index
    %c0_3 = arith.constant 0 : index
    %c0_4 = arith.constant 0 : index
    %9 = vector.load %arg8[%c0_2, %c0_3, %c0_4] : memref<1x16x128xf32, #tpu.memory_space<vmem>>, vector<1x16x128xf32>
    %10 = vector.shape_cast %9 : vector<1x16x128xf32> to vector<16x128xf32>
    %c0_5 = arith.constant 0 : index
    %c0_6 = arith.constant 0 : index
    %11 = vector.load %arg3[%c0_5, %c0_6] : memref<512x128xf32, #tpu.memory_space<vmem>>, vector<512x128xf32>
    %cst = arith.constant dense<0.000000e+00> : vector<16x128xf32>
    %12 = tpu.matmul %8, %11, %cst {dimension_numbers = #tpu.dot_dimension_numbers<[1], [0], [0], [1], [0, 0, 1, 1], [], []>} : vector<16x512xf32>, vector<512x128xf32>, vector<16x128xf32> -> vector<16x128xf32>
    %13 = arith.addf %10, %12 : vector<16x128xf32>
    %c0_7 = arith.constant 0 : index
    %c0_8 = arith.constant 0 : index
    %c0_9 = arith.constant 0 : index
    %14 = vector.load %arg8[%c0_7, %c0_8, %c0_9] : memref<1x16x128xf32, #tpu.memory_space<vmem>>, vector<1x16x128xf32>
    %15 = vector.shape_cast %14 : vector<1x16x128xf32> to vector<16x128xf32>
    %16 = vector.shape_cast %13 : vector<16x128xf32> to vector<1x16x128xf32>
    tpu.vector_store %arg8[%c0_7, %c0_8, %c0_9], %16 {strides = array<i32>} : memref<1x16x128xf32, #tpu.memory_space<vmem>>, vector<1x16x128xf32>,
    %c0_i32_10 = arith.constant 0 : i32
    %17 = arith.cmpi eq, %arg1, %c0_i32_10 : i32
    %18 = arith.extui %17 : i1 to i32
    %c0_i32_11 = arith.constant 0 : i32
    %19 = arith.cmpi ne, %18, %c0_i32_11 : i32
    scf.if %19 {
      %c0_12 = arith.constant 0 : index
      %c0_13 = arith.constant 0 : index
      %c0_14 = arith.constant 0 : index
      %20 = vector.load %arg8[%c0_12, %c0_13, %c0_14] : memref<1x16x128xf32, #tpu.memory_space<vmem>>, vector<1x16x128xf32>
      %21 = vector.shape_cast %20 : vector<1x16x128xf32> to vector<16x128xf32>
      %c0_15 = arith.constant 0 : index
      %c0_16 = arith.constant 0 : index
      %22 = vector.load %arg6[%c0_15, %c0_16] : memref<128x128xf32, #tpu.memory_space<vmem>>, vector<128x128xf32>
      %cst_17 = arith.constant dense<0.000000e+00> : vector<16x128xf32>
      %23 = tpu.matmul %21, %22, %cst_17 {dimension_numbers = #tpu.dot_dimension_numbers<[1], [0], [0], [1], [0, 0, 1, 1], [], []>} : vector<16x128xf32>, vector<128x128xf32>, vector<16x128xf32> -> vector<16x128xf32>
      %c0_18 = arith.constant 0 : index
      %c0_19 = arith.constant 0 : index
      %24 = vector.load %arg4[%c0_18, %c0_19] : memref<16x16xf32, #tpu.memory_space<vmem>>, vector<16x16xf32>
      %c0_20 = arith.constant 0 : index
      %c0_21 = arith.constant 0 : index
      %25 = vector.load %arg5[%c0_20, %c0_21] : memref<16x128xf32, #tpu.memory_space<vmem>>, vector<16x128xf32>
      %cst_22 = arith.constant dense<0.000000e+00> : vector<16x128xf32>
      %26 = tpu.matmul %24, %25, %cst_22 {dimension_numbers = #tpu.dot_dimension_numbers<[1], [0], [0], [1], [0, 0, 1, 1], [], []>} : vector<16x16xf32>, vector<16x128xf32>, vector<16x128xf32> -> vector<16x128xf32>
      %c0_23 = arith.constant 0 : index
      %c0_24 = arith.constant 0 : index
      %27 = vector.load %arg7[%c0_23, %c0_24] : memref<1x128xf32, #tpu.memory_space<vmem>>, vector<1x128xf32>
      %28 = vector.broadcast %27 : vector<1x128xf32> to vector<16x128xf32>
      %29 = arith.addf %26, %28 : vector<16x128xf32>
      %c0_i32_25 = arith.constant 0 : i32
      %30 = arith.cmpi eq, %arg0, %c0_i32_25 : i32
      %31 = arith.extui %30 : i1 to i32
      %32 = arith.sitofp %31 : i32 to f32
      %33 = vector.broadcast %32 : f32 to vector<16x128xf32>
      %34 = arith.mulf %33, %29 : vector<16x128xf32>
      %35 = arith.addf %23, %34 : vector<16x128xf32>
      %c0_26 = arith.constant 0 : index
      %c0_27 = arith.constant 0 : index
      %c0_28 = arith.constant 0 : index
      %36 = vector.load %arg8[%c0_26, %c0_27, %c0_28] : memref<1x16x128xf32, #tpu.memory_space<vmem>>, vector<1x16x128xf32>
      %37 = vector.shape_cast %36 : vector<1x16x128xf32> to vector<16x128xf32>
      %38 = vector.shape_cast %35 : vector<16x128xf32> to vector<1x16x128xf32>
      tpu.vector_store %arg8[%c0_26, %c0_27, %c0_28], %38 {strides = array<i32>} : memref<1x16x128xf32, #tpu.memory_space<vmem>>, vector<1x16x128xf32>,
    } else {
    }
    return
  }
  func.func @transform_0(%arg0: i32, %arg1: i32) -> (i32, i32) {
    %c1_i32 = arith.constant 1 : i32
    %0 = arith.muli %arg0, %c1_i32 : i32
    %1 = arith.addi %0, %arg1 : i32
    %c0_i32 = arith.constant 0 : i32
    %c0_i32_0 = arith.constant 0 : i32
    return %c0_i32, %1 : i32, i32
  }
  func.func @transform_1(%arg0: i32, %arg1: i32) -> (i32, i32) {
    %c1_i32 = arith.constant 1 : i32
    %0 = arith.muli %arg0, %c1_i32 : i32
    %1 = arith.addi %0, %arg1 : i32
    %c0_i32 = arith.constant 0 : i32
    %c0_i32_0 = arith.constant 0 : i32
    return %1, %c0_i32 : i32, i32
  }
  func.func @transform_2(%arg0: i32, %arg1: i32) -> (i32, i32) {
    %c0_i32 = arith.constant 0 : i32
    %c0_i32_0 = arith.constant 0 : i32
    %c0_i32_1 = arith.constant 0 : i32
    return %c0_i32, %c0_i32_0 : i32, i32
  }
  func.func @transform_3(%arg0: i32, %arg1: i32) -> (i32, i32) {
    %c0_i32 = arith.constant 0 : i32
    %c0_i32_0 = arith.constant 0 : i32
    %c0_i32_1 = arith.constant 0 : i32
    return %c0_i32, %c0_i32_0 : i32, i32
  }
  func.func @transform_4(%arg0: i32, %arg1: i32) -> (i32, i32) {
    %c0_i32 = arith.constant 0 : i32
    %c0_i32_0 = arith.constant 0 : i32
    %c0_i32_1 = arith.constant 0 : i32
    return %c0_i32, %c0_i32_0 : i32, i32
  }
  func.func @transform_5(%arg0: i32, %arg1: i32) -> (i32, i32) {
    %c0_i32 = arith.constant 0 : i32
    %c0_i32_0 = arith.constant 0 : i32
    %c0_i32_1 = arith.constant 0 : i32
    return %c0_i32, %c0_i32_0 : i32, i32
  }
  func.func @transform_6(%arg0: i32, %arg1: i32) -> (i32, i32, i32) {
    %c0_i32 = arith.constant 0 : i32
    %c0_i32_0 = arith.constant 0 : i32
    %c0_i32_1 = arith.constant 0 : i32
    return %arg0, %c0_i32, %c0_i32_0 : i32, i32, i32
  }
}

</mosaic_0001>

<bundles_post_ra>
// kernel: tpu_custom_call.1
= control target key start
LH: loop header
LB: loop body
LE: loop exit
PB: predicated region body
PF: predicated region fallthrough
CT: control target
= control target key end

     0   :  { %s2172_s0 = inlined_call_operand.hbm [shape: s32[1,1024], index: 0, kind: input, shape index: {}]   ;;  %s2173_s1 = inlined_call_operand.hbm [shape: f32[1024,128], index: 1, kind: input, shape index: {}]   ;;  %s2174_s2 = inlined_call_operand.hbm [shape: f32[16,16], index: 2, kind: input, shape index: {}]   ;;  %s2175_s3 = inlined_call_operand.hbm [shape: f32[16,128], index: 3, kind: input, shape index: {}]   ;;  %s2176_s4 = inlined_call_operand.hbm [shape: f32[128,128], index: 4, kind: input, shape index: {}]   ;;  %s2177_s5 = inlined_call_operand.hbm [shape: f32[1,128], index: 5, kind: input, shape index: {}]   ;;  %s2178_s6 = inlined_call_operand.hbm [shape: f32[2,16,128], index: 6, kind: output, shape index: {}]  }
   0x1   :  { %2184 = sst [smem:[#allocation20_spill]] %s2172_s0 }
   0x2   :  { %2185 = sst [smem:[#allocation21_spill]] %s2174_s2 }
   0x3   :  { %2186 = sst [smem:[#allocation22_spill]] %s2175_s3 }
   0x4   :  { %2187 = sst [smem:[#allocation23_spill]] %s2176_s4 }
   0x5   :  { %11 = vsyncpa [#allocation3], 0 }
   0x6   :  { %13 = vsyncpa [#allocation3 + $0x1], 0 }
   0x7   :  { %14 = vsyncpa [#allocation6], 0 }
   0x8   :  { %16 = vsyncpa [#allocation6 + $0x1], 0 }
   0x9   :  { %17 = vsyncpa [#allocation9], 0 }
   0xa   :  { %18 = vsyncpa [#allocation12], 0 }
   0xb   :  { %19 = vsyncpa [#allocation4], 0 }
   0xc   :  { %21 = vsyncpa [#allocation4 + $0x1], 0  ;;  %s1733_s21 = smov 0   ;;  %s1735_s22 = smov 0  }
   0xd   :  { %s1737_s23 = smov 0   ;;  %s1739_s24 = smov 0  }
   0xe   :  { %s1741_s25 = smov 0   ;;  %s1743_s26 = smov 0  }
   0xf LB: > { %s1764_s27 = sadd.s32 4294967295, %s1684_s26   ;;  %p1013_p0 = scmp.ge.s32.totalorder %s1684_s26, 1  ;;  %s1684_s26 = sphi %s1743_s26, %s27_s26   ;;  %s1680_s25 = sphi %s1741_s25, %s2218_s25   ;;  %s1676_s24 = sphi %s1739_s24, %s2217_s24   ;;  %s1672_s23 = sphi %s1737_s23, %s2216_s23   ;;  %s1668_s22 = sphi %s1735_s22, %s2215_s22   ;;  %s1664_s21 = sphi %s1733_s21, %s2214_s21  }
  0x10   : > { %p2179_p1 = scmp.eq.s32.totalorder %s1764_s27, 0  ;;  %p210_p2 = scmp.lt.s32.totalorder %s1684_s26, 3 }
  0x11   : > { %s1686_s29 = smov [#allocation7]   ;;  %s1687_s8 = smov [#allocation8]  }
  0x12   : > { %p1769_p3 = pnand %p1013_p0, %p210_p2  ;;  %s222_s30 = sshll.u32 %s1686_s29, 4  ;;  %s1773_s30 = int_to_ptr.vmem [resolvable:$true] %s222_s30 }
  0x13   : > { %s235_s9 = sshll.u32 %s1687_s8, 4  ;;  %s1688_s10 = smov [#allocation10]   ;;  %s1784_s9 = int_to_ptr.vmem [resolvable:$true] %s235_s9 }
  0x14   : > { %s2188_s28 = scalar_select %p1769_p3, 1, 0 }
  0x15   : > { %p1322_p4 = pneg %p1769_p3  ;;  %s1786_s11 = sshll.u32 %s1688_s10, 4  ;;  %s249_s11 = int_to_ptr.vmem [resolvable:$true] %s1786_s11 }
  0x16   : > { %s2190_s2 = sld [smem:[#allocation21_spill]] }
  0x17   : > { %p1780_p6 = pnand %p1322_p4, %p2179_p1 }
  0x19   : > { %p1796_p8 = pneg %p1780_p6 }
  0x1c   : > { %s1414_s14 = scalar_lea.hbm %s2190_s2, 256 }
  0x1d   : > { %p1415_p7 = scmp.ne.s32.totalorder %s2190_s2, %s1414_s14  ;;  %p1421_p11 = scmp.lt.u32.totalorder %s1414_s14, %s2190_s2 }
  0x1f   : > { %p1417_p9 = pnand %p1796_p8, %p1415_p7 }
  0x21   : > { %p1418_p10 = pneg %p1417_p9 }
  0x23   : > { %p1423_p12 = pnand %p1421_p11, %p1418_p10 }
  0x25   : > { %1426 = shalt.err (!%p1423_p12)
}
  0x26   : > { %s1427_s20 = scalar_lea.vmem %s1773_s30, 256  ;;  %p1435_p4 = scmp.lt.s32.totalorder %s1773_s30, %s1773_s30 }
  0x27   : > { %p1428_p13 = scmp.ne.s32.totalorder %s1773_s30, %s1427_s20  ;;  %p1436_p5 = scmp.lt.s32.totalorder %s1427_s20, %s1427_s20 }
  0x29   : > { %p1430_p0 = pnand %p1428_p13, %p1796_p8  ;;  %p1437_p7 = por %p1436_p5, %p1435_p4 }
  0x2b   : > { %p1431_p2 = pneg %p1430_p0 }
  0x2d   : > { %p1438_p9 = pnand %p1437_p7, %p1431_p2 }
  0x2f   : > { %1441 = shalt.err (!%p1438_p9)
}
  0x30   : > { %s2181_s29 = smov 128   ;;  %s2182_s8 = smov 8  }
  0x31   : > { %1325 = dma.hbm_to_vmem [thread:$0]  (!%p1780_p6), %s2190_s2, 256, %s1773_s30, [#allocation6], %s2181_s29, %s2181_s29, %s2182_s8  }
  0x32   : > { %s2192_s3 = sld [smem:[#allocation22_spill]] }
  0x38   : > { %s1442_s15 = scalar_lea.hbm %s2192_s3, 256 }
  0x39   : > { %p1443_p5 = scmp.ne.s32.totalorder %s2192_s3, %s1442_s15  ;;  %p1449_p12 = scmp.lt.u32.totalorder %s1442_s15, %s2192_s3 }
  0x3b   : > { %p1445_p10 = pnand %p1443_p5, %p1796_p8 }
  0x3d   : > { %p1446_p11 = pneg %p1445_p10 }
  0x3f   : > { %p1451_p13 = pnand %p1449_p12, %p1446_p11 }
  0x41   : > { %1454 = shalt.err (!%p1451_p13)
}
  0x42   : > { %s1455_s30 = scalar_lea.vmem %s1784_s9, 256  ;;  %p1463_p7 = scmp.lt.s32.totalorder %s1784_s9, %s1784_s9 }
  0x43   : > { %p1456_p0 = scmp.ne.s32.totalorder %s1784_s9, %s1455_s30  ;;  %p1464_p9 = scmp.lt.s32.totalorder %s1455_s30, %s1455_s30 }
  0x45   : > { %p1458_p2 = pnand %p1456_p0, %p1796_p8  ;;  %p1465_p5 = por %p1464_p9, %p1463_p7 }
  0x47   : > { %p1459_p4 = pneg %p1458_p2 }
  0x49   : > { %p1466_p10 = pnand %p1465_p5, %p1459_p4 }
  0x4b   : > { %1469 = shalt.err (!%p1466_p10)
}
  0x4c   : > { %1328 = dma.hbm_to_vmem [thread:$0]  (!%p1780_p6), %s2192_s3, 256, %s1784_s9, [#allocation9], %s2181_s29, %s2181_s29, %s2182_s8  }
  0x4d   : > { %s2193_s4 = sld [smem:[#allocation23_spill]] }
  0x53   : > { %s1470_s15 = scalar_lea.hbm %s2193_s4, 2048 }
  0x54   : > { %p1471_p11 = scmp.ne.s32.totalorder %s2193_s4, %s1470_s15  ;;  %p1477_p0 = scmp.lt.u32.totalorder %s1470_s15, %s2193_s4 }
  0x56   : > { %p1473_p12 = pnand %p1471_p11, %p1796_p8 }
  0x58   : > { %p1474_p13 = pneg %p1473_p12 }
  0x5a   : > { %p1479_p2 = pnand %p1477_p0, %p1474_p13 }
  0x5c   : > { %1482 = shalt.err (!%p1479_p2)
}
  0x5d   : > { %s1483_s30 = scalar_lea.vmem %s249_s11, 2048  ;;  %p1491_p5 = scmp.lt.s32.totalorder %s249_s11, %s249_s11 }
  0x5e   : > { %p1484_p4 = scmp.ne.s32.totalorder %s249_s11, %s1483_s30  ;;  %p1492_p10 = scmp.lt.s32.totalorder %s1483_s30, %s1483_s30 }
  0x60   : > { %p1486_p7 = pnand %p1484_p4, %p1796_p8  ;;  %p1493_p1 = por %p1492_p10, %p1491_p5 }
  0x62   : > { %p1487_p9 = pneg %p1486_p7 }
  0x64   : > { %p1494_p3 = pnand %p1493_p1, %p1487_p9 }
  0x66   : > { %1497 = shalt.err (!%p1494_p3)
}
  0x67   : > { %1331 = dma.hbm_to_vmem [thread:$0]  (!%p1780_p6), %s2193_s4, 2048, %s249_s11, [#allocation9], %s2181_s29, %s2181_s29, %s2182_s8  }
  0x68   : > { %s1691_s12 = smov [#allocation11]   ;;  %s1498_s16 = scalar_lea.hbm %s2177_s5, 16 }
  0x69   : > { %s262_s13 = sshll.u32 %s1691_s12, 4  ;;  %p1499_p1 = scmp.ne.s32.totalorder %s2177_s5, %s1498_s16  ;;  %s263_s13 = int_to_ptr.vmem [resolvable:$true] %s262_s13 }
  0x6a   : > { %p1505_p12 = scmp.lt.u32.totalorder %s1498_s16, %s2177_s5 }
  0x6b   : > { %p1501_p3 = pnand %p1499_p1, %p1796_p8 }
  0x6d   : > { %p1502_p11 = pneg %p1501_p3 }
  0x6f   : > { %p1507_p13 = pnand %p1505_p12, %p1502_p11 }
  0x71   : > { %1510 = shalt.err (!%p1507_p13)
}
  0x72   : > { %s1511_s11 = scalar_lea.vmem %s263_s13, 16  ;;  %s1518_s9 = scalar_lea.vmem %s263_s13, 32 }
  0x73   : > { %p1512_p0 = scmp.ne.s32.totalorder %s263_s13, %s1511_s11  ;;  %p1519_p7 = scmp.lt.s32.totalorder %s263_s13, %s263_s13 }
  0x74   : > { %p1520_p9 = scmp.lt.s32.totalorder %s1518_s9, %s1511_s11 }
  0x75   : > { %p1514_p2 = pnand %p1512_p0, %p1796_p8 }
  0x76   : > { %p1521_p5 = por %p1520_p9, %p1519_p7 }
  0x77   : > { %p1515_p4 = pneg %p1514_p2 }
  0x79   : > { %p1522_p10 = pnand %p1521_p5, %p1515_p4 }
  0x7b   : > { %1525 = shalt.err (!%p1522_p10)
}
  0x7c   : > { %1334 = dma.hbm_to_vmem [thread:$0]  (!%p1780_p6), %s2177_s5, 16, %s263_s13, [#allocation12]  }
  0x7d   : > { %s1012_s17 = sadd.s32 4294967294, %s1684_s26   ;;  %s39_s14 = sadd.s32 1, %s1680_s25 }
  0x7e   : > { %p41_p8 = scmp.ge.s32.totalorder %s39_s14, 2  ;;  %s48_s7 = sadd.s32 1, %s1672_s23 }
  0x7f   : > { %p55_p1 = scmp.ne.s32.totalorder %s1672_s23, %s1668_s22  ;;  %p56_p3 = scmp.eq.s32.totalorder %s1684_s26, 0 }
  0x80   : > { %s2220_s14 = smov (%p41_p8, %s39_s14), 0  ;;  %p61_p12 = scmp.ne.s32.totalorder %s1668_s22, %s1664_s21 }
  0x81   : > { %p1894_p11 = por %p56_p3, %p55_p1  ;;  %s45_s13 = ssub.s32 %s1680_s25, %s2220_s14 }
  0x82   : > { %p197_p6 = scmp.eq.s32.totalorder %s1764_s27, 1  ;;  %p46_p13 = scmp.eq.s32.totalorder %s45_s13, 0 }
  0x83   : > { %p2195_p0 = scmp.eq.s32.totalorder %s1764_s27, 0  ;;  %p203_p7 = scmp.eq.s32.totalorder %s1012_s17, 1 }
  0x84   : > { %p1909_p4 = por %p197_p6, %p55_p1  ;;  %p1350_p5 = scmp.lt.s32.totalorder %s1684_s26, 2 }
  0x85   : > { %p1905_p2 = por %p2195_p0, %p61_p12  ;;  %p1916_p9 = por %p203_p7, %p61_p12 }
  0x86   : > { %s2197_s18 = scalar_select %p1909_p4, 1, 0 }
  0x87   : > { %s1914_s19 = scalar_select %p46_p13, %s1672_s23, %s48_s7  }
  0x88   : > { %s2198_s20 = scalar_select %p1916_p9, 1, 0 }
  0x89   : > { %s1922_s30 = sand.u32 1, %s1672_s23   ;;  %s1057_s11 = sshll.u32 %s1680_s25, 6 }
  0x8a   : > { %s1019_s9 = sshll.u32 %s1922_s30, 2  ;;  %s2199_s0 = sld [smem:[#allocation20_spill]] }
  0x8b   : > { %s277_s17 = scalar_lea.vmem [#allocation2], %s1019_s9  ;;  %p1933_p10 = pnand %p1350_p5, %p1894_p11 }
  0x8c   : > { %s286_s7 = sshll.u32 %s277_s17, 4  ;;  %s274_s2 = scalar_lea.sflag [#allocation3], %s1922_s30  ;;  %s1937_s7 = int_to_ptr.vmem [resolvable:$true] %s286_s7 }
  0x8d   : > { %p1528_p1 = pneg %p1933_p10 }
  0x90   : > { %s1929_s13 = scalar_lea.hbm %s2199_s0, %s1057_s11  ;;  %s1531_s9 = scalar_lea.hbm %s2199_s0, 128 }
  0x91   : > { %s1526_s10 = scalar_lea.hbm %s1929_s13, 64  ;;  %p1532_p11 = scmp.lt.u32.totalorder %s1929_s13, %s2199_s0 }
  0x92   : > { %p1527_p8 = scmp.ne.s32.totalorder %s1929_s13, %s1526_s10  ;;  %p1533_p6 = scmp.lt.u32.totalorder %s1531_s9, %s1526_s10 }
  0x93   : > { %p1535_p0 = scmp.lt.u32.totalorder %s1526_s10, %s1929_s13 }
  0x94   : > { %p1529_p3 = pnand %p1528_p1, %p1527_p8  ;;  %p1534_p13 = por %p1533_p6, %p1532_p11 }
  0x96   : > { %p1530_p12 = pneg %p1529_p3  ;;  %p1536_p7 = por %p1535_p0, %p1534_p13 }
  0x98   : > { %p1537_p5 = pnand %p1536_p7, %p1530_p12 }
  0x9a   : > { %1540 = shalt.err (!%p1537_p5)
}
  0x9b   : > { %s1541_s8 = scalar_lea.vmem %s1937_s7, 64  ;;  %s1692_s11 = smov [#allocation2]  }
  0x9c   : > { %p1542_p8 = scmp.ne.s32.totalorder %s1937_s7, %s1541_s8  ;;  %s1546_s15 = sshll.u32 %s1692_s11, 4  ;;  %s1547_s15 = int_to_ptr.vmem [resolvable:$false] %s1546_s15 }
  0x9d   : > { %s1548_s12 = scalar_lea.vmem %s1547_s15, 128  ;;  %p1549_p4 = scmp.lt.s32.totalorder %s1937_s7, %s1547_s15 }
  0x9e   : > { %p1544_p3 = pnand %p1542_p8, %p1528_p1  ;;  %p1550_p11 = scmp.lt.s32.totalorder %s1548_s12, %s1541_s8 }
  0xa0   : > { %p1545_p9 = pneg %p1544_p3  ;;  %p1551_p6 = por %p1550_p11, %p1549_p4 }
  0xa2   : > { %p1552_p13 = pnand %p1551_p6, %p1545_p9 }
  0xa4   : > { %1555 = shalt.err (!%p1552_p13)
}
  0xa5   : > { %1338 = dma.hbm_to_vmem [thread:$0]  (!%p1933_p10), %s1929_s13, 64, %s1937_s7, %s274_s2  }
  0xa6   : > { %s1058_s10 = sshll.u32 %s1680_s25, 13  ;;  %s2201_s9 = sshll.u32 %s1922_s30, 9 }
  0xa7   : > { %s297_s17 = scalar_lea.vmem [#allocation5], %s2201_s9  ;;  %s293_s15 = sand.u32 1, %s1684_s26  }
  0xa8   : > { %s305_s11 = sshll.u32 %s297_s17, 4  ;;  %s1975_s0 = scalar_lea.hbm %s2173_s1, %s1058_s10  ;;  %s1969_s11 = int_to_ptr.vmem [resolvable:$true] %s305_s11 }
  0xa9   : > { %s1977_s3 = scalar_lea.sflag [#allocation6], %s293_s15  ;;  %s1556_s4 = scalar_lea.hbm %s1975_s0, 8192 }
  0xaa   : > { %p1557_p4 = scmp.ne.s32.totalorder %s1975_s0, %s1556_s4  ;;  %s1561_s13 = scalar_lea.hbm %s2173_s1, 16384 }
  0xab   : > { %p1562_p0 = scmp.lt.u32.totalorder %s1975_s0, %s2173_s1  ;;  %p1563_p7 = scmp.lt.u32.totalorder %s1561_s13, %s1556_s4 }
  0xac   : > { %p1559_p9 = pnand %p1557_p4, %p1528_p1  ;;  %p1565_p8 = scmp.lt.u32.totalorder %s1556_s4, %s1975_s0 }
  0xad   : > { %p1564_p5 = por %p1563_p7, %p1562_p0 }
  0xae   : > { %p1560_p12 = pneg %p1559_p9 }
  0xaf   : > { %p1566_p3 = por %p1565_p8, %p1564_p5 }
  0xb1   : > { %p1567_p11 = pnand %p1566_p3, %p1560_p12 }
  0xb3   : > { %1570 = shalt.err (!%p1567_p11)
}
  0xb4   : > { %s1571_s10 = scalar_lea.vmem %s1969_s11, 8192  ;;  %s1693_s17 = smov [#allocation5]  }
  0xb5   : > { %p1572_p6 = scmp.ne.s32.totalorder %s1969_s11, %s1571_s10  ;;  %s1576_s15 = sshll.u32 %s1693_s17, 4  ;;  %s1577_s15 = int_to_ptr.vmem [resolvable:$false] %s1576_s15 }
  0xb6   : > { %s1578_s8 = scalar_lea.vmem %s1577_s15, 16384  ;;  %p1579_p9 = scmp.lt.s32.totalorder %s1969_s11, %s1577_s15 }
  0xb7   : > { %p1574_p13 = pnand %p1572_p6, %p1528_p1  ;;  %p1580_p0 = scmp.lt.s32.totalorder %s1578_s8, %s1571_s10 }
  0xb9   : > { %p1575_p4 = pneg %p1574_p13  ;;  %p1581_p7 = por %p1580_p0, %p1579_p9 }
  0xbb   : > { %p1582_p5 = pnand %p1581_p7, %p1575_p4 }
  0xbd   : > { %1585 = shalt.err (!%p1582_p5)
}
  0xbe   : > { %s2202_s4 = smov 8   ;;  %s2203_s12 = smov 128  }
  0xbf   : > { %1341 = dma.hbm_to_vmem [thread:$0]  (!%p1933_p10), %s1975_s0, 8192, %s1969_s11, %s1977_s3, %s2203_s12, %s2203_s12, %s2202_s4  }
  0xc0   : > { %p2204_p1 = scmp.ne.s32.totalorder %s2188_s28, 0 }
  0xc1   : > { %s2009_s2 = sand.u32 (!%p2204_p1), 1, %s1668_s22  }
  0xc2   : > { %317 = sbr.rel (%p2204_p1) target bundleno = 703 (0x2bf), region = 44  ;;  %s1026_s30 = sshll.u32 (!%p2204_p1), %s2009_s2, 2 }
  0xc3   : > { %s320_s13 = scalar_lea.sflag (!%p2204_p1), [#allocation3], %s2009_s2  ;;  %s2013_s7 = scalar_lea.vmem (!%p2204_p1), [#allocation2], %s1026_s30 }
  0xc9   : > { %1639 = dma.done.wait (%p1905_p2), %s320_s13, 64  }
  0xca   : > { %1641 = vsyncadd (%p1905_p2), %s320_s13, 4294967232  ;;  %s328_s0 = sand.u32 1, %s1764_s27   ;;  %s1027_s3 = sshll.u32 %s2009_s2, 9 }
  0xcb   : > { %s329_s28 = scalar_lea.sflag [#allocation6], %s328_s0  ;;  %s2021_s29 = scalar_lea.vmem [#allocation5], %s1027_s3 }
  0xcc   : > { %1643 = dma.done.wait (%p1905_p2), %s329_s28, 8192  }
  0xcd   : > { %1645 = vsyncadd (%p1905_p2), %s329_s28, 4294959104  ;;  %p2205_p10 = scmp.eq.s32.totalorder %s1764_s27, 0 }
  0xcf   : > { %1647 = dma.done.wait (%p2205_p10), [#allocation6], 256   ;;  %p2206_p12 = pmov %p2205_p10 }
  0xd0   : > { %p2207_p8 = pmov %p2205_p10 }
  0xd1   : > { %1649 = vsyncadd (%p2206_p12), [#allocation6], 4294967040 }
  0xd2   : > { %1651 = dma.done.wait (%p2207_p8), [#allocation9], 2304   ;;  %p2208_p3 = pmov %p2207_p8 }
  0xd4   : > { %1653 = vsyncadd (%p2208_p3), [#allocation9], 4294964992  ;;  %p2209_p11 = pmov %p2208_p3 }
  0xd5   : > { %p2210_p6 = pmov %p2208_p3 }
  0xd6   : > { %1655 = dma.done.wait (%p2209_p11), [#allocation12], 16  }
  0xd7   : > { %1657 = vsyncadd (%p2210_p6), [#allocation12], 4294967280  ;;  %v454_v0 = vld [vmem:[%s2021_s29 + $0x80] sm:$0xff]  ;;  %v455_v1 = vld [vmem:[%s2021_s29 + $0x88] sm:$0xff]  ;;  %v392_v47 = vlaneseq  ;;  %vm688_vm8 = vcmask 130048   ;;  %p770_p2 = scmp.eq.s32.totalorder %s1676_s24, 0 }
  0xd8   : > { %v486_v2 = vld [vmem:[%s2021_s29 + $0x180] sm:$0xff]  ;;  %v1200_v3 = vpack.c.bf16 %v455_v1, %v454_v0  ;;  %v487_v4 = vld [vmem:[%s2021_s29 + $0x188] sm:$0xff]  ;;  %v456_v11 = vld [vmem:[%s2021_s29 + $0x90] sm:$0xff]  ;;  %s1032_s11 = sshll.u32 %s2009_s2, 4  ;;  %s1059_s9 = sshll.u32 %s1676_s24, 8 }
  0xd9   : > { %v438_v5 = vld [vmem:[%s2021_s29] sm:$0xff]  ;;  %v439_v6 = vld [vmem:[%s2021_s29 + $0x8] sm:$0xff]  ;;  %v1232_v7 = vpack.c.bf16 %v487_v4, %v486_v2  ;;  %v457_v13 = vld [vmem:[%s2021_s29 + $0x98] sm:$0xff]  ;;  %v2081_v61 = vshrl.u32 %v392_v47, 7  ;;  %s771_s27 = scalar_select %p770_p2, 1, 0 }
  0xda   : > { %v1202_v8 = vpack.c.bf16 %v439_v6, %v438_v5  ;;  %v470_v9 = vld [vmem:[%s2021_s29 + $0x100] sm:$0xff]  ;;  %v471_v10 = vld [vmem:[%s2021_s29 + $0x108] sm:$0xff]  ;;  %1201 = vmatprep.subr.bf16.mxu0 %v1200_v3  ;;  %v488_v14 = vld [vmem:[%s2021_s29 + $0x190] sm:$0xff]  ;;  %v1204_v16 = vpack.c.bf16 %v457_v13, %v456_v11  ;;  %s381_s10 = scalar_lea.vmem [#allocation13], %s1032_s11  ;;  %s2121_s4 = scalar_lea.hbm %s2178_s6, %s1059_s9 }
  0xdb   : > { %v1234_v12 = vpack.c.bf16 %v471_v10, %v470_v9  ;;  %v489_v15 = vld [vmem:[%s2021_s29 + $0x198] sm:$0xff]  ;;  %1233 = vmatprep.subr.bf16.mxu1 %v1232_v7  ;;  %v440_v18 = vld [vmem:[%s2021_s29 + $0x10] sm:$0xff]  ;;  %v458_v23 = vld [vmem:[%s2021_s29 + $0xa0] sm:$0xff]  ;;  %v402_v10 = vsub.s32 1, %v2081_v61  ;;  %v410_v11 = vsub.s32 3, %v2081_v61  ;;  %s772_s16 = scvt.s32.f32 %s771_s27  ;;  %s867_s17 = sshll.u32 %s381_s10, 4  ;;  %s2123_s17 = int_to_ptr.vmem [resolvable:$true] %s867_s17 }
  0xdc   : > { %1203 = vmatpush3.bf16.msra.mxu0 %v1202_v8  ;;  %v1236_v17 = vpack.c.bf16 %v489_v15, %v488_v14  ;;  %v441_v19 = vld [vmem:[%s2021_s29 + $0x18] sm:$0xff]  ;;  %v472_v20 = vld [vmem:[%s2021_s29 + $0x110] sm:$0xff]  ;;  %v459_v24 = vld [vmem:[%s2021_s29 + $0xa8] sm:$0xff]  ;;  %s854_s12 = scalar_lea.sflag [#allocation4], %s2009_s2  ;;  %s1586_s24 = scalar_lea.vmem %s2123_s17, 256 }
  0xdd   : > { %1235 = vmatpush3.bf16.msra.mxu1 %v1234_v12  ;;  %v1206_v21 = vpack.c.bf16 %v441_v19, %v440_v18  ;;  %v473_v22 = vld [vmem:[%s2021_s29 + $0x118] sm:$0xff]  ;;  %1205 = vmatprep.subr.bf16.mxu0 %v1204_v16  ;;  %v1208_v26 = vpack.c.bf16 %v459_v24, %v458_v23  ;;  %v490_v27 = vld [vmem:[%s2021_s29 + $0x1a0] sm:$0xff]  ;;  %v491_v28 = vld [vmem:[%s2021_s29 + $0x1a8] sm:$0xff]  ;;  %p1587_p13 = scmp.ne.s32.totalorder %s2123_s17, %s1586_s24  ;;  %p2211_p4 = scmp.ne.s32.totalorder %s2197_s18, 0 }
  0xde   : > { %1237 = vmatprep.subr.bf16.mxu1 %v1236_v17  ;;  %v1238_v25 = vpack.c.bf16 %v473_v22, %v472_v20  ;;  %v442_v29 = vld [vmem:[%s2021_s29 + $0x20] sm:$0xff]  ;;  %v1240_v30 = vpack.c.bf16 %v491_v28, %v490_v27  ;;  %v443_v31 = vld [vmem:[%s2021_s29 + $0x28] sm:$0xff]  ;;  %v460_v35 = vld [vmem:[%s2021_s29 + $0xb0] sm:$0xff]  ;;  %s1695_s30 = smov [#allocation13]  }
  0xdf   : > { %v474_v32 = vld [vmem:[%s2021_s29 + $0x120] sm:$0xff]  ;;  %v475_v33 = vld [vmem:[%s2021_s29 + $0x128] sm:$0xff]  ;;  %v1210_v34 = vpack.c.bf16 %v443_v31, %v442_v29  ;;  %v461_v36 = vld [vmem:[%s2021_s29 + $0xb8] sm:$0xff]  ;;  %p1588_p9 = pnand %p1587_p13, %p2211_p4  ;;  %s1590_s13 = sshll.u32 %s1695_s30, 4  ;;  %s1591_s13 = int_to_ptr.vmem [resolvable:$false] %s1590_s13 }
  0xe0   : > { %1207 = vmatpush3.bf16.msra.mxu0 %v1206_v21  ;;  %v492_v37 = vld [vmem:[%s2021_s29 + $0x1b0] sm:$0xff]  ;;  %v1242_v38 = vpack.c.bf16 %v475_v33, %v474_v32  ;;  %v1212_v39 = vpack.c.bf16 %v461_v36, %v460_v35  ;;  %v493_v40 = vld [vmem:[%s2021_s29 + $0x1b8] sm:$0xff]  ;;  %v462_v46 = vld [vmem:[%s2021_s29 + $0xc0] sm:$0xff]  ;;  %v406_v35 = vsub.s32 2, %v2081_v61  ;;  %p1593_p7 = scmp.lt.s32.totalorder %s2123_s17, %s1591_s13 }
  0xe1   : > { %1239 = vmatpush3.bf16.msra.mxu1 %v1238_v25  ;;  %1209 = vmatprep.subr.bf16.mxu0 %v1208_v26  ;;  %v444_v41 = vld [vmem:[%s2021_s29 + $0x30] sm:$0xff]  ;;  %v445_v42 = vld [vmem:[%s2021_s29 + $0x38] sm:$0xff]  ;;  %v1244_v43 = vpack.c.bf16 %v493_v40, %v492_v37  ;;  %v463_v48 = vld [vmem:[%s2021_s29 + $0xc8] sm:$0xff]  ;;  %p1589_p0 = pneg %p1588_p9 }
  0xe2   : > { %1241 = vmatprep.subr.bf16.mxu1 %v1240_v30  ;;  %v476_v44 = vld [vmem:[%s2021_s29 + $0x130] sm:$0xff]  ;;  %v477_v45 = vld [vmem:[%s2021_s29 + $0x138] sm:$0xff]  ;;  %v494_v49 = vld [vmem:[%s2021_s29 + $0x1c0] sm:$0xff]  ;;  %v1214_v51 = vpack.c.bf16 %v445_v42, %v444_v41  ;;  %v1216_v53 = vpack.c.bf16 %v463_v48, %v462_v46  ;;  %v398_v30 = vsub.s32 0, %v2081_v61  ;;  %v394_v46 = vadd.s32 8, %v2081_v61 }
  0xe3   : > { %v495_v50 = vld [vmem:[%s2021_s29 + $0x1c8] sm:$0xff]  ;;  %v1246_v52 = vpack.c.bf16 %v477_v45, %v476_v44  ;;  %v446_v54 = vld [vmem:[%s2021_s29 + $0x40] sm:$0xff]  ;;  %v464_v59 = vld [vmem:[%s2021_s29 + $0xd0] sm:$0xff] }
  0xe4   : > { %1211 = vmatpush3.bf16.msra.mxu0 %v1210_v34  ;;  %v447_v55 = vld [vmem:[%s2021_s29 + $0x48] sm:$0xff]  ;;  %v478_v56 = vld [vmem:[%s2021_s29 + $0x140] sm:$0xff]  ;;  %v1248_v57 = vpack.c.bf16 %v495_v50, %v494_v49  ;;  %v465_v60 = vld [vmem:[%s2021_s29 + $0xd8] sm:$0xff] }
  0xe5   : > { %1243 = vmatpush3.bf16.msra.mxu1 %v1242_v38  ;;  %1213 = vmatprep.subr.bf16.mxu0 %v1212_v39  ;;  %v479_v58 = vld [vmem:[%s2021_s29 + $0x148] sm:$0xff]  ;;  %v496_v62 = vld [vmem:[%s2021_s29 + $0x1d0] sm:$0xff]  ;;  %v497_v63 = vld [vmem:[%s2021_s29 + $0x1d8] sm:$0xff]  ;;  %v1218_v0 = vpack.c.bf16 %v447_v55, %v446_v54  ;;  %v1220_v2 = vpack.c.bf16 %v465_v60, %v464_v59  ;;  %v1694_v39 = vmov 1.0  }
  0xe6   : > { %1245 = vmatprep.subr.bf16.mxu1 %v1244_v43  ;;  %v1250_v1 = vpack.c.bf16 %v479_v58, %v478_v56  ;;  %v448_v3 = vld [vmem:[%s2021_s29 + $0x50] sm:$0xff]  ;;  %v449_v4 = vld [vmem:[%s2021_s29 + $0x58] sm:$0xff]  ;;  %v1252_v6 = vpack.c.bf16 %v497_v63, %v496_v62  ;;  %v466_v8 = vld [vmem:[%s2021_s29 + $0xe0] sm:$0xff] }
  0xe7   : > { %v480_v5 = vld [vmem:[%s2021_s29 + $0x150] sm:$0xff]  ;;  %v481_v7 = vld [vmem:[%s2021_s29 + $0x158] sm:$0xff]  ;;  %v467_v9 = vld [vmem:[%s2021_s29 + $0xe8] sm:$0xff]  ;;  %v1222_v14 = vpack.c.bf16 %v449_v4, %v448_v3 }
  0xe8   : > { %1215 = vmatpush3.bf16.msra.mxu0 %v1214_v51  ;;  %v498_v12 = vld [vmem:[%s2021_s29 + $0x1e0] sm:$0xff]  ;;  %v499_v13 = vld [vmem:[%s2021_s29 + $0x1e8] sm:$0xff]  ;;  %v1254_v16 = vpack.c.bf16 %v481_v7, %v480_v5  ;;  %v1224_v17 = vpack.c.bf16 %v467_v9, %v466_v8  ;;  %v395_v20 = vld [vmem:[%s2013_s7] sm:$0xf]  ;;  %s1592_s7 = scalar_lea.vmem %s1591_s13, 512 }
  0xe9   : > { %1247 = vmatpush3.bf16.msra.mxu1 %v1246_v52  ;;  %1217 = vmatprep.subr.bf16.mxu0 %v1216_v53  ;;  %v450_v15 = vld [vmem:[%s2021_s29 + $0x60] sm:$0xff]  ;;  %v451_v18 = vld [vmem:[%s2021_s29 + $0x68] sm:$0xff]  ;;  %v1256_v21 = vpack.c.bf16 %v499_v13, %v498_v12  ;;  %v468_v23 = vld [vmem:[%s2021_s29 + $0xf0] sm:$0xff]  ;;  %v403_v25 = vrot.slane %v395_v20, %v402_v10  ;;  %v411_v26 = vrot.slane %v395_v20, %v410_v11  ;;  %p1594_p5 = scmp.lt.s32.totalorder %s1592_s7, %s1586_s24 }
  0xea   : > { %1249 = vmatprep.subr.bf16.mxu1 %v1248_v57  ;;  %v482_v19 = vld [vmem:[%s2021_s29 + $0x160] sm:$0xff]  ;;  %v483_v22 = vld [vmem:[%s2021_s29 + $0x168] sm:$0xff]  ;;  %v469_v24 = vld [vmem:[%s2021_s29 + $0xf8] sm:$0xff]  ;;  %v1226_v29 = vpack.c.bf16 %v451_v18, %v450_v15  ;;  %v399_v43 = vrot.slane %v395_v20, %v398_v30  ;;  %v407_v45 = vrot.slane %v395_v20, %v406_v35 }
  0xeb   : > { %v500_v27 = vld [vmem:[%s2021_s29 + $0x1f0] sm:$0xff]  ;;  %v501_v28 = vld [vmem:[%s2021_s29 + $0x1f8] sm:$0xff]  ;;  %vm413_vm0 = vcmp.eq.s32.totalorder %v2081_v61, %v403_v25  ;;  %vm415_vm1 = vcmp.eq.s32.totalorder %v2081_v61, %v411_v26  ;;  %v1258_v31 = vpack.c.bf16 %v483_v22, %v482_v19  ;;  %v1228_v32 = vpack.c.bf16 %v469_v24, %v468_v23  ;;  %v661_v40 = vld [vmem:[#allocation10] sm:$0xff]  ;;  %p1595_p1 = por %p1594_p5, %p1593_p7 }
  0xec   : > { %1219 = vmatpush3.bf16.msra.mxu0 %v1218_v0  ;;  %v452_v33 = vld [vmem:[%s2021_s29 + $0x70] sm:$0xff]  ;;  %v453_v34 = vld [vmem:[%s2021_s29 + $0x78] sm:$0xff]  ;;  %v1260_v36 = vpack.c.bf16 %v501_v28, %v500_v27  ;;  %1041 = vmatprep.mubr.msk.f32.mxu0 %vm413_vm0, %v1694_v39  ;;  %v662_v41 = vld [vmem:[#allocation10 + $0x8] sm:$0xff]  ;;  %vm412_vm2 = vcmp.eq.s32.totalorder %v2081_v61, %v399_v43  ;;  %vm414_vm3 = vcmp.eq.s32.totalorder %v2081_v61, %v407_v45 }
  0xed   : > { %1251 = vmatpush3.bf16.msra.mxu1 %v1250_v1  ;;  %1221 = vmatprep.subr.bf16.mxu0 %v1220_v2  ;;  %v484_v37 = vld [vmem:[%s2021_s29 + $0x170] sm:$0xff]  ;;  %v485_v38 = vld [vmem:[%s2021_s29 + $0x178] sm:$0xff]  ;;  %v1230_v42 = vpack.c.bf16 %v453_v34, %v452_v33  ;;  %v1268_v47 = vpack.c.bf16 %v662_v41, %v661_v40  ;;  %vm417_vm4 = vcmp.eq.s32.totalorder %v394_v46, %v403_v25  ;;  %v665_v51 = vld [vmem:[#allocation10 + $0x20] sm:$0xff]  ;;  %p1596_p10 = pnand %p1595_p1, %p1589_p0 }
  0xee   : > { %1253 = vmatprep.subr.bf16.mxu1 %v1252_v6  ;;  %1045 = vmatprep.mubr.msk.f32.mxu1 %vm415_vm1, %v1694_v39  ;;  %v1262_v44 = vpack.c.bf16 %v485_v38, %v484_v37  ;;  %v663_v48 = vld [vmem:[#allocation10 + $0x10] sm:$0xff]  ;;  %v664_v49 = vld [vmem:[#allocation10 + $0x18] sm:$0xff]  ;;  %vm419_vm5 = vcmp.eq.s32.totalorder %v394_v46, %v411_v26  ;;  %v666_v52 = vld [vmem:[#allocation10 + $0x28] sm:$0xff]  ;;  %vm416_vm6 = vcmp.eq.s32.totalorder %v394_v46, %v399_v43 }
  0xef   : > { %v1272_v50 = vpack.c.bf16 %v664_v49, %v663_v48  ;;  %vm418_vm7 = vcmp.eq.s32.totalorder %v394_v46, %v407_v45  ;;  %v1276_v53 = vpack.c.bf16 %v666_v52, %v665_v51  ;;  %v667_v54 = vld [vmem:[#allocation10 + $0x30] sm:$0xff]  ;;  %v668_v55 = vld [vmem:[#allocation10 + $0x38] sm:$0xff]  ;;  %v669_v57 = vld [vmem:[#allocation10 + $0x40] sm:$0xff] }
  0xf0   : > { %1223 = vmatpush3.bf16.msra.mxu0 %v1222_v14  ;;  %v1280_v56 = vpack.c.bf16 %v668_v55, %v667_v54  ;;  %v670_v58 = vld [vmem:[#allocation10 + $0x48] sm:$0xff]  ;;  %v671_v60 = vld [vmem:[#allocation10 + $0x50] sm:$0xff]  ;;  %v672_v61 = vld [vmem:[#allocation10 + $0x58] sm:$0xff] }
  0xf1   : > { %1255 = vmatpush3.bf16.msra.mxu1 %v1254_v16  ;;  %1225 = vmatprep.subr.bf16.mxu0 %v1224_v17  ;;  %v1284_v59 = vpack.c.bf16 %v670_v58, %v669_v57  ;;  %v1288_v62 = vpack.c.bf16 %v672_v61, %v671_v60  ;;  %v679_v63 = vld [vmem:[#allocation8] sm:$0xff]  ;;  %v680_v0 = vld [vmem:[#allocation8 + $0x8] sm:$0xff]  ;;  %v673_v2 = vld [vmem:[#allocation10 + $0x60] sm:$0xff] }
  0xf2   : > { %1257 = vmatprep.subr.bf16.mxu1 %v1256_v21  ;;  %v1264_v1 = vpack.c.bf16 %v680_v0, %v679_v63  ;;  %v674_v3 = vld [vmem:[#allocation10 + $0x68] sm:$0xff]  ;;  %v677_v5 = vld [vmem:[#allocation7] sm:$0xff]  ;;  %v675_v6 = vld [vmem:[#allocation10 + $0x70] sm:$0xff] }
  0xf3   : > { %v1292_v4 = vpack.c.bf16 %v674_v3, %v673_v2  ;;  %v676_v7 = vld [vmem:[#allocation10 + $0x78] sm:$0xff]  ;;  %v678_v8 = vld [vmem:[#allocation7 + $0x8] sm:$0xff]  ;;  %v1049_v26 = vld [vmem:[#allocation11] ss:$0 sm:$0xff] }
  0xf4   : > { %1227 = vmatpush3.bf16.msra.mxu0 %v1226_v29  ;;  %v1296_v9 = vpack.c.bf16 %v676_v7, %v675_v6  ;;  %v773_v29 = vstv %s772_s16 }
  0xf5   : > { %1259 = vmatpush3.bf16.msra.mxu1 %v1258_v31  ;;  %1229 = vmatprep.subr.bf16.mxu0 %v1228_v32 }
  0xf6   : > { %1261 = vmatprep.subr.bf16.mxu1 %v1260_v36 }
  0xf8   : > { %1231 = vmatpush3.bf16.msra.mxu0 %v1230_v42 }
  0xf9   : > { %1263 = vmatpush3.bf16.msra.mxu1 %v1262_v44  ;;  %1265 = vmatprep.subr.bf16.mxu0 %v1264_v1 }
  0xfa   : > { %1269 = vmatprep.subr.bf16.mxu1 %v1268_v47 }
  0xfb   : > { %1042 = vmatmul.mubr.msk.f32.vlgmr.msra.gmra.mrb[0].mxu0 %vm412_vm2, %v1694_v39 }
  0xfc   : > { %1046 = vmatmul.mubr.msk.f32.vlgmr.msra.gmra.mrb[0].mxu1 %vm414_vm3, %v1694_v39  ;;  %1043 = vmatprep.mubr.msk.f32.mxu0 %vm417_vm4, %v1694_v39 }
  0xfd   : > { %1047 = vmatprep.mubr.msk.f32.mxu1 %vm419_vm5, %v1694_v39  ;;  %1271 = vmatpush3.bf16.msra.mxu1 %v1268_v47 }
  0xfe   : > { %1273 = vmatprep.subr.bf16.mxu1 %v1272_v50  ;;  %1267 = vmatpush3.bf16.msra.mxu0 %v1264_v1 }
  0xff   : > { %1044 = vmatmul.mubr.msk.f32.gmra.mrb[2].mxu0 %vm416_vm6, %v1694_v39 }
 0x100   : > { %1048 = vmatmul.mubr.msk.f32.gmra.mrb[2].mxu1 %vm418_vm7, %v1694_v39  ;;  %1162 = vmatprep.mubr.msk.f32.mxu0 %vm688_vm8, %v677_v5 }
 0x101   : > { %1275 = vmatpush3.bf16.msra.mxu1 %v1272_v50 }
 0x102   : > { %1277 = vmatprep.subr.bf16.mxu1 %v1276_v53 }
 0x103   : > { %1163 = vmatmul.mubr.msk.f32.vlgmr.msra.gmra.mrb[4].mxu0 %vm688_vm8, %v678_v8 }
 0x105   : > { %1279 = vmatpush3.bf16.msra.mxu1 %v1276_v53 }
 0x106   : > { %1281 = vmatprep.subr.bf16.mxu1 %v1280_v56 }
 0x109   : > { %1283 = vmatpush3.bf16.msra.mxu1 %v1280_v56 }
 0x10a   : > { %1285 = vmatprep.subr.bf16.mxu1 %v1284_v59 }
 0x10d   : > { %1287 = vmatpush3.bf16.msra.mxu1 %v1284_v59 }
 0x10e   : > { %1289 = vmatprep.subr.bf16.mxu1 %v1288_v62 }
 0x111   : > { %1291 = vmatpush3.bf16.msra.mxu1 %v1288_v62 }
 0x112   : > { %1293 = vmatprep.subr.bf16.mxu1 %v1292_v4 }
 0x115   : > { %1295 = vmatpush3.bf16.msra.mxu1 %v1292_v4 }
 0x116   : > { %1297 = vmatprep.subr.bf16.mxu1 %v1296_v9 }
 0x119   : > { %1299 = vmatpush3.bf16.msra.mxu1 %v1296_v9 }
 0x1ce   : > { %v1092_v10 = vpop.f32.mrb[0].mxu0 }
 0x1cf   : > { %v1130_v11 = vpop.f32.mrb[0].mxu1  ;;  %v1093_v12 = vpop.f32.mrb[1].mxu0 }
 0x1d0   : > { %v1094_v13 = vadd.f32 %v1093_v12, %v1092_v10  ;;  %v1131_v14 = vpop.f32.mrb[1].mxu1 }
 0x1d1   : > { %v1132_v15 = vadd.f32 %v1131_v14, %v1130_v11 }
 0x1d2   : > { %v1095_v16 = vpop.f32.mrb[2].mxu0 }
 0x1d3   : > { %v644_v17 = vadd.f32 %v1132_v15, %v1094_v13  ;;  %v1133_v18 = vpop.f32.mrb[2].mxu1  ;;  %v1096_v19 = vpop.f32.mrb[3].mxu0 }
 0x1d4   : > { %v1097_v20 = vadd.f32 %v1096_v19, %v1095_v16  ;;  %v1134_v21 = vpop.f32.mrb[3].mxu1 }
 0x1d5   : > { %v1135_v22 = vadd.f32 %v1134_v21, %v1133_v18  ;;  %1197 = vmatprep.mubr.f32.mxu1 %v644_v17 }
 0x1d6   : > { %v1164_v24 = vpop.f32.mrb[4].mxu0 }
 0x1d7   : > { %v649_v23 = vadd.f32 %v1135_v22, %v1097_v20  ;;  %v761_v25 = vpop.f32.mrb[5].mxu0  ;;  %v767_v27 = vadd.f32 %v1164_v24, %v1049_v26 }
 0x1d8   : > { %v762_v28 = vadd.f32 %v1049_v26, %v761_v25 }
 0x1d9   : > { %1198 = vmatmul.mubr.f32.vlgmr.msra.gmra.mrb[4].mxu1 %v649_v23  ;;  %v775_v30 = vmul.f32 %v773_v29, %v767_v27 }
 0x1da   : > { %v774_v31 = vmul.f32 %v773_v29, %v762_v28 }
 0x2ac   : > { %v1199_v32 = vpop.f32.mrb[4].mxu1 }
 0x2ad   : > { %v848_v33 = vadd.f32 %v1199_v32, %v775_v30  ;;  %v842_v34 = vpop.f32.mrb[5].mxu1 }
 0x2ae   : > { %v843_v35 = vadd.f32 %v842_v34, %v774_v31 }
 0x2af   : > { %852 = vst [vmem:[%s381_s10 + $0x8] sm:$0xff] %v848_v33 }
 0x2b0   : > { %851 = vst [vmem:[%s381_s10] sm:$0xff] %v843_v35 }
 0x2b1   : > { %1599 = shalt.err (!%p1596_p10)
}
 0x2b2   : > { %s1600_s0 = scalar_lea.hbm %s2121_s4, 256  ;;  %s1604_s29 = scalar_lea.hbm %s2178_s6, 512 }
 0x2b3   : > { %p1601_p12 = scmp.ne.s32.totalorder %s2121_s4, %s1600_s0  ;;  %p1605_p11 = scmp.lt.u32.totalorder %s2121_s4, %s2178_s6 }
 0x2b4   : > { %p1606_p6 = scmp.lt.u32.totalorder %s1604_s29, %s1600_s0  ;;  %p1608_p13 = scmp.lt.u32.totalorder %s1600_s0, %s2121_s4 }
 0x2b5   : > { %p1602_p8 = pnand %p1601_p12, %p2211_p4 }
 0x2b6   : > { %p1607_p2 = por %p1606_p6, %p1605_p11 }
 0x2b7   : > { %p1603_p3 = pneg %p1602_p8 }
 0x2b8   : > { %p1609_p9 = por %p1608_p13, %p1607_p2 }
 0x2ba   : > { %p1610_p0 = pnand %p1609_p9, %p1603_p3 }
 0x2bc   : > { %1613 = shalt.err (!%p1610_p0)
}
 0x2bd   : > { %s1696_s11 = smov 128   ;;  %s1697_s9 = smov 8  }
 0x2be   : > { %1320 = dma.vmem_to_hbm [thread:$0]  (%p2211_p4), %s2123_s17, 256, %s2121_s4, %s854_s12, %s1696_s11, %s1696_s11, %s1697_s9  }
 0x2bf PF: > { %s882_s10 = sand.u32 1, %s1664_s21   ;;  %p2212_p7 = scmp.ne.s32.totalorder %s2198_s20, 0 }
 0x2c0   : > { %p2213_p5 = scmp.ge.s32.totalorder %s1684_s26, 2  ;;  %s883_s15 = scalar_lea.sflag [#allocation4], %s882_s10 }
 0x2c2   : > { %p1343_p1 = pnand %p2213_p5, %p2212_p7 }
 0x2c4   : > { %1659 = dma.done.wait (!%p1343_p1), %s883_s15, 256  }
 0x2c5   : > { %1661 = vsyncadd (!%p1343_p1), %s883_s15, 4294967040  ;;  %s27_s26 = sadd.s32 1, %s1684_s26   ;;  %s2214_s21 = smov %s1668_s22 }
 0x2c6   : > { %p24_p10 = scmp.ge.s32.totalorder %s27_s26, 4   ;;  %s2215_s22 = smov %s1672_s23 }
 0x2c7   : > { %s2216_s23 = smov %s1914_s19  ;;  %s2217_s24 = smov %s1680_s25 }
 0x2c8   : > { %s2218_s25 = smov %s2220_s14  ;;  %26 = sbr.rel (!%p24_p10) target bundleno = 15 (0xf), region = 126 }
 0x2cf   :  { %888 = vsyncpa [#allocation3], 1 }
 0x2d0   :  { %890 = vsyncpa [#allocation3 + $0x1], 1 }
 0x2d1   :  { %891 = vsyncpa [#allocation6], 1 }
 0x2d2   :  { %893 = vsyncpa [#allocation6 + $0x1], 1 }
 0x2d3   :  { %894 = vsyncpa [#allocation9], 1 }
 0x2d4   :  { %895 = vsyncpa [#allocation12], 1 }
 0x2d5   :  { %896 = vsyncpa [#allocation4], 1 }
 0x2d6   :  { %898 = vsyncpa [#allocation4 + $0x1], 1 }

</bundles_post_ra>
